<compile_context>
chip_gen: v7x
topology: tpu7x:2x2x1
jax: 0.10.0
libtpu: 0.0.40
codegen_flags: <defaults>
</compile_context>

<pallas_src>
import functools

import jax
import jax.numpy as jnp
from jax import lax
from jax.experimental import pallas as pl
from jax.experimental.pallas import tpu as pltpu


# ---------------------------------------------------------------------------
# Kernels
# ---------------------------------------------------------------------------

def _cam_fused_kernel(gamma_ref, x_ref, out_ref, *, bf16_mxu):
    """Single pass: energy -> softmax -> gamma*(att@X) + X for one batch slice."""
    x = x_ref[...]                                             # (C, Np), native dtype
    xm = x.astype(jnp.bfloat16) if bf16_mxu else x
    # energy = X @ X^T without materializing the transpose.
    energy = lax.dot_general(
        xm, xm, dimension_numbers=(((1,), (1,)), ((), ())),
        preferred_element_type=jnp.float32)                    # (C, C) f32
    # softmax(rowmax(e) - e) with the stability shift collapses to
    # exp(rowmin(e) - e) / rowsum  -> a single lane-axis reduction.
    row_min = jnp.min(energy, axis=-1, keepdims=True)
    p = jnp.exp(row_min - energy)
    att = p / jnp.sum(p, axis=-1, keepdims=True)               # exact reciprocal (tiny)
    att = (gamma_ref[0] * att).astype(xm.dtype)                # fold gamma + cast
    out = jnp.dot(att, xm, preferred_element_type=jnp.float32)
    out_ref[...] = (out + x.astype(jnp.float32)).astype(out_ref.dtype)


def _cam_pass1_kernel(gamma_ref, x_ref, att_ref, acc_ref, *, bf16_mxu):
    """Pass 1: Gram accumulation over N chunks + softmax finalize (gamma folded).

    x_ref:   (C, tn) chunk of the flattened input, native dtype.
    att_ref: (C, C) output block in x.dtype (written only on the last chunk).
    acc_ref: (C, C) f32 VMEM scratch accumulator (persists across the N axis).
    """
    n = pl.program_id(1)

    @pl.when(n == 0)
    def _():
        acc_ref[...] = jnp.zeros_like(acc_ref)

    xc = x_ref[...]
    if bf16_mxu:
        xc = xc.astype(jnp.bfloat16)
    # energy += X_chunk @ X_chunk^T (contract the chunk axis of both operands).
    acc_ref[...] += lax.dot_general(
        xc, xc, dimension_numbers=(((1,), (1,)), ((), ())),
        preferred_element_type=jnp.float32)

    @pl.when(n == pl.num_programs(1) - 1)
    def _():
        energy = acc_ref[...]                                   # (C, C) f32
        row_min = jnp.min(energy, axis=-1, keepdims=True)
        p = jnp.exp(row_min - energy)
        att = p / jnp.sum(p, axis=-1, keepdims=True)            # exact reciprocal
        # gamma and the dtype cast happen exactly once here (not per pass-2 chunk).
        att_ref[...] = (gamma_ref[0] * att).astype(att_ref.dtype)


def _cam_pass2_kernel(att_ref, x_ref, out_ref, *, bf16_mxu):
    """Pass 2: out_chunk = (gamma*att) @ X_chunk + X_chunk (pure dot + add)."""
    xc = x_ref[...]                                             # (C, tn) native dtype
    att = att_ref[...]                                          # (C, C)  x.dtype
    if bf16_mxu:
        att = att.astype(jnp.bfloat16)
        rhs = xc.astype(jnp.bfloat16)
    else:
        rhs = xc
    out = jnp.dot(att, rhs, preferred_element_type=jnp.float32)
    out_ref[...] = (out + xc.astype(jnp.float32)).astype(out_ref.dtype)


# ---------------------------------------------------------------------------
# Wrapper
# ---------------------------------------------------------------------------

def _round_up(a, b):
    return (a + b - 1) // b * b


def _vmem_capacity_bytes():
    """Physical per-core VMEM; conservative 64 MiB (v7x) fallback if unknown."""
    try:
        return int(pltpu.get_tpu_info().vmem_capacity_bytes)
    except Exception:  # pragma: no cover - defensive
        return 64 << 20


def _pick_n_tile(n, c, itemsize, budget_bytes, requested=None):
    """Largest 128-multiple tile (<= 2048 or `requested`) whose pass-2 working
    set (2 x-chunk bufs + 2 out-chunk bufs + att copies) fits the VMEM budget."""
    cap = 2048 if requested is None else max(128, (requested // 128) * 128)
    tn = max(128, min(cap, _round_up(n, 128)))
    tn = (tn // 128) * 128

    def fits(t):
        return 4 * c * t * itemsize + 2 * c * c * itemsize <= budget_bytes

    while tn > 128 and not fits(tn):
        tn -= 128
    return tn


def cam_module(x, gamma, *, n_tile=None, fused=None, bf16_mxu=None):
    """Pallas implementation of CAM_Module.forward.

    x:     (B, C, depth, height, width)
    gamma: (1,)  (the nn.Parameter)
    n_tile:   optional N-chunk override (rounded down to a multiple of 128).
    fused:    force/forbid the single-pass VMEM-resident path (None = auto).
    bf16_mxu: feed the MXU bf16 operands for f32 inputs (None = auto: C >= 256).
              Accumulation stays f32; this slightly changes numerics.
    returns: (B, C, depth, height, width)
    """
    B, C = x.shape[0], x.shape[1]
    N = x.shape[2] * x.shape[3] * x.shape[4]
    itemsize = jnp.dtype(x.dtype).itemsize
    gamma = jnp.asarray(gamma, dtype=jnp.float32).reshape((1,))

    cap = _vmem_capacity_bytes()
    budget = min(cap // 2, 64 << 20)          # what our double-buffered tiles may use
    vmem_limit = min((cap * 3) // 4, 128 << 20)

    if bf16_mxu is None:
        bf16_mxu = (x.dtype == jnp.float32) and (C >= 256)

    x_flat = x.reshape(B, C, N)               # pure reshape, no transpose

    # ----- fused single-pass path: one batch slice of X resident in VMEM -----
    np_fused = _round_up(N, 128)
    fused_bytes = 4 * C * np_fused * itemsize + 6 * C * C * 4
    if fused is None:
        fused = fused_bytes <= budget

    compiler_kwargs = dict(vmem_limit_bytes=vmem_limit)

    if fused:
        Np = np_fused
        if Np != N:
            x_flat = jnp.pad(x_flat, ((0, 0), (0, 0), (0, Np - N)))
        out_flat = pl.pallas_call(
            functools.partial(_cam_fused_kernel, bf16_mxu=bf16_mxu),
            out_shape=jax.ShapeDtypeStruct((B, C, Np), x.dtype),
            grid_spec=pltpu.PrefetchScalarGridSpec(
                num_scalar_prefetch=0,
                grid=(B,),
                in_specs=[
                    pl.BlockSpec(memory_space=pltpu.SMEM),            # gamma scalar
                    pl.BlockSpec((None, C, Np), lambda b: (b, 0, 0)),  # full X slice
                ],
                out_specs=pl.BlockSpec((None, C, Np), lambda b: (b, 0, 0)),
            ),
            compiler_params=pltpu.CompilerParams(
                dimension_semantics=("parallel",), **compiler_kwargs),
        )(gamma, x_flat)
        if Np != N:
            out_flat = out_flat[:, :, :N]
        return out_flat.reshape(x.shape)

    # ----- two-pass streaming path ------------------------------------------
    tn = _pick_n_tile(N, C, itemsize, budget, requested=n_tile)
    Np = _round_up(N, tn)                     # zero-pad instead of a tn=N fallback
    if Np != N:
        x_flat = jnp.pad(x_flat, ((0, 0), (0, 0), (0, Np - N)))
    num_n = Np // tn

    # Pass 1: per-batch (gamma-scaled) attention matrix, streaming X in N chunks.
    att = pl.pallas_call(
        functools.partial(_cam_pass1_kernel, bf16_mxu=bf16_mxu),
        out_shape=jax.ShapeDtypeStruct((B, C, C), x.dtype),
        grid_spec=pltpu.PrefetchScalarGridSpec(
            num_scalar_prefetch=0,
            grid=(B, num_n),
            in_specs=[
                pl.BlockSpec(memory_space=pltpu.SMEM),                 # gamma scalar
                pl.BlockSpec((None, C, tn), lambda b, n: (b, 0, n)),   # x chunk
            ],
            out_specs=pl.BlockSpec((None, C, C), lambda b, n: (b, 0, 0)),
            scratch_shapes=[pltpu.VMEM((C, C), jnp.float32)],          # f32 accumulator
        ),
        compiler_params=pltpu.CompilerParams(
            dimension_semantics=("parallel", "arbitrary"), **compiler_kwargs),
    )(gamma, x_flat)

    # Pass 2: stream X again; every (b, n) tile is independent -> fully parallel.
    out_flat = pl.pallas_call(
        functools.partial(_cam_pass2_kernel, bf16_mxu=bf16_mxu),
        out_shape=jax.ShapeDtypeStruct((B, C, Np), x.dtype),
        grid_spec=pltpu.PrefetchScalarGridSpec(
            num_scalar_prefetch=0,
            grid=(B, num_n),
            in_specs=[
                pl.BlockSpec((None, C, C), lambda b, n: (b, 0, 0)),    # gamma*attention
                pl.BlockSpec((None, C, tn), lambda b, n: (b, 0, n)),   # x chunk
            ],
            out_specs=pl.BlockSpec((None, C, tn), lambda b, n: (b, 0, n)),
        ),
        compiler_params=pltpu.CompilerParams(
            dimension_semantics=("parallel", "parallel"), **compiler_kwargs),
    )(att, x_flat)

    if Np != N:
        out_flat = out_flat[:, :, :N]
    return out_flat.reshape(x.shape)


# ---------------------------------------------------------------------------
# Pure-JAX reference (mirrors the PyTorch forward exactly)
# ---------------------------------------------------------------------------

def cam_module_reference(x, gamma):
    B, C = x.shape[0], x.shape[1]
    q = x.reshape(B, C, -1)
    energy = jnp.einsum("bcn,bdn->bcd", q, q, precision="highest")
    energy_new = jnp.max(energy, axis=-1, keepdims=True) - energy
    att = jax.nn.softmax(energy_new, axis=-1)
    out = jnp.einsum("bcd,bdn->bcn", att, q, precision="highest")
    return gamma[0] * out.reshape(x.shape) + x


if __name__ == "__main__":
    key = jax.random.PRNGKey(0)
    k1, k2 = jax.random.split(key)

    # nn.Parameter(torch.zeros(1)) in the module; use a nonzero value so the
    # attention path is actually exercised.
    gamma = jnp.array([0.5], dtype=jnp.float32)

    # Case 1: small aligned shape, fused single-pass path (X fits in VMEM).
    B, C, D, H, W = 2, 4, 8, 8, 8                 # N = 512
    x1 = jax.random.normal(k1, (B, C, D, H, W), dtype=jnp.float32)
    ref1 = cam_module_reference(x1, gamma)

    out1 = jax.block_until_ready(cam_module(x1, gamma))               # auto -> fused
    assert out1.shape == x1.shape
    assert jnp.allclose(out1, ref1, atol=2e-3, rtol=2e-3), "fused path mismatch"

    # Case 2: forced two-pass streaming path with multi-chunk Gram accumulation.
    out2 = jax.block_until_ready(cam_module(x1, gamma, fused=False, n_tile=128))
    assert jnp.allclose(out2, ref1, atol=2e-3, rtol=2e-3), "two-pass mismatch"

    # Case 3: awkward N (not a multiple of 128) -> zero-padding, fused path.
    B2, C2, D2, H2, W2 = 1, 6, 5, 6, 7            # N = 210 -> padded to 256
    x3 = jax.random.normal(k2, (B2, C2, D2, H2, W2), dtype=jnp.float32)
    ref3 = cam_module_reference(x3, gamma)

    out3 = jax.block_until_ready(cam_module(x3, gamma))
    assert jnp.allclose(out3, ref3, atol=2e-3, rtol=2e-3), "padded fused mismatch"

    # Case 4: awkward N, forced two-pass path (padding + 2 chunks of 128).
    out4 = jax.block_until_ready(cam_module(x3, gamma, fused=False, n_tile=128))
    assert jnp.allclose(out4, ref3, atol=2e-3, rtol=2e-3), "padded two-pass mismatch"

    print("KERNEL_OK")
</pallas_src>

<mosaic_0001>
module attributes {stable_mosaic.version = 11 : i64} {
  func.func @_cam_fused_kernel(%arg0: i32, %arg1: memref<1xf32, #tpu.memory_space<smem>>, %arg2: memref<1x4x512xf32, #tpu.memory_space<vmem>>, %arg3: memref<1x4x512xf32, #tpu.memory_space<vmem>>) attributes {dimension_semantics = [#tpu.dimension_semantics<parallel>], iteration_bounds = array<i64: 2>, scalar_prefetch = 0 : i64, scratch_operands = 0 : i64, tpu.core_type = #tpu.core_type<tc>, window_params = [{transform_indices = @transform_0, window_bounds = array<i64: 1>}, {transform_indices = @transform_1, window_bounds = array<i64: 1, 4, 512>}, {transform_indices = @transform_2, window_bounds = array<i64: 1, 4, 512>}]} {
    %c0 = arith.constant 0 : index
    %c0_0 = arith.constant 0 : index
    %c0_1 = arith.constant 0 : index
    %0 = vector.load %arg2[%c0, %c0_0, %c0_1] : memref<1x4x512xf32, #tpu.memory_space<vmem>>, vector<1x4x512xf32>
    %1 = vector.shape_cast %0 : vector<1x4x512xf32> to vector<4x512xf32>
    %cst = arith.constant dense<0.000000e+00> : vector<4x4xf32>
    %2 = tpu.matmul %1, %1, %cst {dimension_numbers = #tpu.dot_dimension_numbers<[1], [1], [0], [0], [0, 0, 1, 0], [], []>} : vector<4x512xf32>, vector<4x512xf32>, vector<4x4xf32> -> vector<4x4xf32>
    %cst_2 = arith.constant dense<0x7F800000> : vector<4xf32>
    %3 = vector.multi_reduction <minimumf>, %2, %cst_2 [1] : vector<4x4xf32> to vector<4xf32>
    %4 = vector.shape_cast %3 : vector<4xf32> to vector<4x1xf32>
    %5 = vector.broadcast %4 : vector<4x1xf32> to vector<4x4xf32>
    %6 = arith.subf %5, %2 : vector<4x4xf32>
    %7 = math.exp %6 : vector<4x4xf32>
    %cst_3 = arith.constant dense<0.000000e+00> : vector<4xf32>
    %8 = vector.multi_reduction <add>, %7, %cst_3 [1] : vector<4x4xf32> to vector<4xf32>
    %9 = vector.shape_cast %8 : vector<4xf32> to vector<4x1xf32>
    %10 = vector.broadcast %9 : vector<4x1xf32> to vector<4x4xf32>
    %11 = arith.divf %7, %10 : vector<4x4xf32>
    %c0_4 = arith.constant 0 : index
    %12 = memref.load %arg1[%c0_4] : memref<1xf32, #tpu.memory_space<smem>>
    %13 = vector.broadcast %12 : f32 to vector<4x4xf32>
    %14 = arith.mulf %13, %11 : vector<4x4xf32>
    %cst_5 = arith.constant dense<0.000000e+00> : vector<4x512xf32>
    %15 = tpu.matmul %14, %1, %cst_5 {dimension_numbers = #tpu.dot_dimension_numbers<[1], [0], [0], [1], [0, 0, 1, 1], [], []>} : vector<4x4xf32>, vector<4x512xf32>, vector<4x512xf32> -> vector<4x512xf32>
    %16 = arith.addf %15, %1 : vector<4x512xf32>
    %c0_6 = arith.constant 0 : index
    %c0_7 = arith.constant 0 : index
    %c0_8 = arith.constant 0 : index
    %17 = vector.load %arg3[%c0_6, %c0_7, %c0_8] : memref<1x4x512xf32, #tpu.memory_space<vmem>>, vector<1x4x512xf32>
    %18 = vector.shape_cast %17 : vector<1x4x512xf32> to vector<4x512xf32>
    %19 = vector.shape_cast %16 : vector<4x512xf32> to vector<1x4x512xf32>
    tpu.vector_store %arg3[%c0_6, %c0_7, %c0_8], %19 {strides = array<i32>} : memref<1x4x512xf32, #tpu.memory_space<vmem>>, vector<1x4x512xf32>,
    return
  }
  func.func @transform_0(%arg0: i32) -> i32 {
    %c0_i32 = arith.constant 0 : i32
    %c0_i32_0 = arith.constant 0 : i32
    return %c0_i32 : i32
  }
  func.func @transform_1(%arg0: i32) -> (i32, i32, i32) {
    %c0_i32 = arith.constant 0 : i32
    %c0_i32_0 = arith.constant 0 : i32
    %c0_i32_1 = arith.constant 0 : i32
    return %arg0, %c0_i32, %c0_i32_0 : i32, i32, i32
  }
  func.func @transform_2(%arg0: i32) -> (i32, i32, i32) {
    %c0_i32 = arith.constant 0 : i32
    %c0_i32_0 = arith.constant 0 : i32
    %c0_i32_1 = arith.constant 0 : i32
    return %arg0, %c0_i32, %c0_i32_0 : i32, i32, i32
  }
}

</mosaic_0001>

<bundles_post_ra>
// kernel: tpu_custom_call.1
= control target key start
LH: loop header
LB: loop body
LE: loop exit
PB: predicated region body
PF: predicated region fallthrough
CT: control target
= control target key end

     0   :  { %s935_s0 = inlined_call_operand.<no memory space> [shape: f32[1], index: 0, kind: input, shape index: {}]   ;;  %s936_s1 = inlined_call_operand.hbm [shape: f32[2,4,512], index: 1, kind: input, shape index: {}]   ;;  %s937_s2 = inlined_call_operand.hbm [shape: f32[2,4,512], index: 2, kind: output, shape index: {}]  }
   0x1   :  { %7 = sst [smem:[#allocation2]] %s935_s0 }
   0x2   :  { %8 = vsyncpa [#allocation4], 0 }
   0x3   :  { %10 = vsyncpa [#allocation4 + $0x1], 0 }
   0x4   :  { %11 = vsyncpa [#allocation5], 0 }
   0x5   :  { %13 = vsyncpa [#allocation5 + $0x1], 0  ;;  %s770_s11 = smov 0   ;;  %s772_s12 = smov 0  }
   0x6   :  { %s774_s13 = smov 0   ;;  %s776_s14 = smov 0  }
   0x7 LB: > { %s791_s0 = sadd.s32 4294967295, %s747_s14   ;;  %s574_s15 = sadd.s32 4294967294, %s747_s14   ;;  %s747_s14 = sphi %s776_s14, %s952_s14   ;;  %s743_s13 = sphi %s774_s13, %s951_s13   ;;  %s739_s12 = sphi %s772_s12, %s950_s12   ;;  %s735_s11 = sphi %s770_s11, %s949_s11  }
   0x8   : > { %s795_s16 = sadd.s32 1, %s747_s14   ;;  %s47_s17 = sadd.s32 1, %s743_s13 }
   0x9   : > { %s44_s18 = ssub.s32 %s747_s14, %s795_s16  ;;  %p54_p0 = scmp.ne.s32.totalorder %s743_s13, %s739_s12 }
   0xa   : > { %p45_p1 = scmp.eq.s32.totalorder %s44_s18, 0  ;;  %p55_p2 = scmp.eq.s32.totalorder %s747_s14, 0 }
   0xb   : > { %p60_p3 = scmp.ne.s32.totalorder %s739_s12, %s735_s11  ;;  %p61_p4 = scmp.eq.s32.totalorder %s791_s0, 0 }
   0xc   : > { %s807_s19 = scalar_select %p45_p1, %s743_s13, %s47_s17  }
   0xd   : > { %p809_p5 = por %p55_p2, %p54_p0  ;;  %p813_p6 = por %p61_p4, %p60_p3 }
   0xe   : > { %p84_p7 = scmp.eq.s32.totalorder %s791_s0, 1  ;;  %p90_p8 = scmp.eq.s32.totalorder %s574_s15, 1 }
   0xf   : > { %p610_p10 = scmp.lt.s32.totalorder %s747_s14, 2  ;;  %s113_s24 = sand.u32 1, %s743_s13  }
  0x10   : > { %p820_p11 = por %p84_p7, %p54_p0  ;;  %p824_p12 = por %p90_p8, %p60_p3 }
  0x11   : > { %s594_s25 = sshll.u32 %s747_s14, 8  ;;  %s577_s26 = sshll.u32 %s113_s24, 4 }
  0x12   : > { %s941_s22 = scalar_select %p820_p11, 1, 0 }
  0x13   : > { %s942_s23 = scalar_select %p824_p12, 1, 0 }
  0x14   : > { %s833_s29 = scalar_lea.hbm %s936_s1, %s594_s25  ;;  %s117_s30 = scalar_lea.vmem [#allocation3], %s577_s26 }
  0x15   : > { %s125_s3 = sshll.u32 %s117_s30, 4  ;;  %p837_p13 = pnand %p610_p10, %p809_p5  ;;  %s841_s3 = int_to_ptr.vmem [resolvable:$true] %s125_s3 }
  0x16   : > { %s114_s5 = scalar_lea.sflag [#allocation4], %s113_s24  ;;  %s651_s6 = scalar_lea.hbm %s833_s29, 256 }
  0x17   : > { %p652_p2 = scmp.ne.s32.totalorder %s833_s29, %s651_s6  ;;  %p653_p3 = pneg %p837_p13 }
  0x18   : > { %s656_s9 = scalar_lea.hbm %s936_s1, 512  ;;  %p657_p5 = scmp.lt.u32.totalorder %s833_s29, %s936_s1 }
  0x19   : > { %p654_p4 = pnand %p653_p3, %p652_p2  ;;  %p658_p8 = scmp.lt.u32.totalorder %s656_s9, %s651_s6 }
  0x1a   : > { %p660_p9 = scmp.lt.u32.totalorder %s651_s6, %s833_s29 }
  0x1b   : > { %p655_p7 = pneg %p654_p4  ;;  %p659_p10 = por %p658_p8, %p657_p5 }
  0x1d   : > { %p661_p0 = por %p660_p9, %p659_p10 }
  0x1f   : > { %p662_p1 = pnand %p661_p0, %p655_p7 }
  0x21   : > { %665 = shalt.err (!%p662_p1)
}
  0x22   : > { %s666_s17 = scalar_lea.vmem %s841_s3, 256  ;;  %s749_s18 = smov [#allocation3]  }
  0x23   : > { %p667_p2 = scmp.ne.s32.totalorder %s841_s3, %s666_s17  ;;  %s671_s20 = sshll.u32 %s749_s18, 4  ;;  %s672_s20 = int_to_ptr.vmem [resolvable:$false] %s671_s20 }
  0x24   : > { %s673_s24 = scalar_lea.vmem %s672_s20, 512  ;;  %p674_p11 = scmp.lt.s32.totalorder %s841_s3, %s672_s20 }
  0x25   : > { %p669_p4 = pnand %p667_p2, %p653_p3  ;;  %p675_p5 = scmp.lt.s32.totalorder %s673_s24, %s666_s17 }
  0x27   : > { %p670_p12 = pneg %p669_p4  ;;  %p676_p8 = por %p675_p5, %p674_p11 }
  0x29   : > { %p677_p9 = pnand %p676_p8, %p670_p12 }
  0x2b   : > { %680 = shalt.err (!%p677_p9)
}
  0x2c   : > { %605 = dma.hbm_to_vmem [thread:$0]  (!%p837_p13), %s833_s29, 256, %s841_s3, %s114_s5  }
  0x2d   : > { %p944_p0 = scmp.lt.s32.totalorder %s747_s14, 3  ;;  %p945_p1 = scmp.ge.s32.totalorder %s747_s14, 1 }
  0x2f   : > { %p131_p3 = pnand %p945_p1, %p944_p0 }
  0x30   : > { %s875_s25 = sand.u32 (!%p131_p3), 1, %s739_s12  }
  0x31   : > { %134 = sbr.rel (%p131_p3) target bundleno = 835 (0x343), region = 28  ;;  %s581_s26 = sshll.u32 (!%p131_p3), %s875_s25, 4 }
  0x32   : > { %s137_s27 = scalar_lea.sflag (!%p131_p3), [#allocation4], %s875_s25  ;;  %s140_s28 = scalar_lea.vmem (!%p131_p3), [#allocation3], %s581_s26 }
  0x38   : > { %726 = dma.done.wait (%p813_p6), %s137_s27, 256  }
  0x39   : > { %728 = vsyncadd (%p813_p6), %s137_s27, 4294967040  ;;  %v161_v0 = vld [vmem:[%s140_s28] sm:$0xff]  ;;  %v162_v1 = vld [vmem:[%s140_s28 + $0x8] sm:$0xff]  ;;  %vm309_vm0 = vcmask 27648   ;;  %vm328_vm1 = vcmask 1043456   ;;  %v750_v12 = vmov 0.0  }
  0x3a   : > { %v165_v2 = vcombine.high %v161_v0, %v161_v0  ;;  %v166_v3 = vcombine.high %v162_v1, %v162_v1  ;;  %401 = vmatprep.mubr.f32.mxu1 %v750_v12  ;;  %s321_s21 = sld [smem:[#allocation2]]  ;;  %vm324_vm2 = vcmask 31744   ;;  %s595_s29 = sshll.u32 %s791_s0, 8 }
  0x3b   : > { %s160_s30 = scalar_lea.vmem [#allocation6], %s581_s26  ;;  %s891_s6 = scalar_lea.hbm %s937_s2, %s595_s29 }
  0x3c   : > { %169 = vmatprep.subr.mxu0 %v165_v2  ;;  %233 = vmatprep.mubr.f32.mxu0 %v165_v2  ;;  %s504_s3 = sshll.u32 %s160_s30, 4  ;;  %s490_s7 = scalar_lea.sflag [#allocation5], %s875_s25  ;;  %s893_s3 = int_to_ptr.vmem [resolvable:$true] %s504_s3 }
  0x3d   : > { %170 = vmatpush1.xpose.msra.mxu0 %v161_v0  ;;  %583 = vmatprep.subr.msk.mxu1 %vm328_vm1, %v165_v2  ;;  %s681_s8 = scalar_lea.vmem %s893_s3, 256  ;;  %p946_p11 = scmp.ne.s32.totalorder %s941_s22, 0 }
  0x3e   : > { %239 = vmatprep.subr.mxu0 %v166_v3  ;;  %584 = vmatpush1.msk.msra.mxu1 %vm328_vm1, %v161_v0  ;;  %p682_p6 = scmp.ne.s32.totalorder %s893_s3, %s681_s8  ;;  %s751_s0 = smov [#allocation6]  }
  0x3f   : > { %586 = vmatprep.subr.msk.mxu1 %vm328_vm1, %v166_v3  ;;  %s685_s9 = sshll.u32 %s751_s0, 4  ;;  %s686_s9 = int_to_ptr.vmem [resolvable:$false] %s685_s9 }
  0x40   : > { %234 = vmatmul.mubr.f32.vlgmr.msra.gmra.mrb[0].mxu0 %v161_v0  ;;  %v322_v15 = vstv %s321_s21  ;;  %p683_p12 = pnand %p682_p6, %p946_p11  ;;  %s687_s10 = scalar_lea.vmem %s686_s9, 512 }
  0x41   : > { %240 = vmatpush1.xpose.msra.mxu0 %v162_v1  ;;  %303 = vmatprep.mubr.f32.mxu0 %v166_v3  ;;  %p688_p7 = scmp.lt.s32.totalorder %s893_s3, %s686_s9  ;;  %p689_p10 = scmp.lt.s32.totalorder %s687_s10, %s681_s8 }
  0x42   : > { %p684_p13 = pneg %p683_p12 }
  0x43   : > { %p690_p2 = por %p689_p10, %p688_p7 }
  0x45   : > { %p691_p4 = pnand %p690_p2, %p684_p13 }
  0x48   : > { %304 = vmatmul.mubr.f32.vlgmr.msra.gmra.mrb[0].mxu0 %v162_v1 }
 0x11b   : > { %v305_v4 = vpop.f32.mrb[0].mxu0 }
 0x11c   : > { %v307_v5 = vpop.f32.mrb[1].mxu0  ;;  %v310_v6 = vsel %vm309_vm0, %v305_v4, inf }
 0x11d   : > { %311 = vmin.xlane.f32.xlu0 %v310_v6 }
 0x1aa   : > { %v312_v7 = vpop.xlane.xlu0 %311 }
 0x1ab   : > { %v313_v8 = vsub.f32 %v312_v7, %v305_v4 }
 0x1ad   : > { %v314_v9 = vmul.f32 1.442695, %v313_v8 }
 0x1af   : > { %647 = vpow2.f32 %v314_v9 }
 0x1b9   : > { %v648_v10 = vpop.eup %647 }
 0x1ba   : > { %v316_v11 = vsel %vm309_vm0, %v648_v10, 0.0 }
 0x1bb   : > { %317 = vadd.xlane.f32.xlu0 %v316_v11 }
 0x248   : > { %v318_v13 = vpop.xlane.xlu0 %317 }
 0x249   : > { %649 = vrcp.f32 %v318_v13 }
 0x253   : > { %v650_v14 = vpop.eup %649 }
 0x254   : > { %v320_v16 = vmul.f32 %v650_v14, %v648_v10 }
 0x256   : > { %v323_v17 = vmul.f32 %v322_v15, %v320_v16 }
 0x258   : > { %585 = vmatmul.mubr.msk.f32.vlgmr.msra.gmra.mrb[0].mxu1 %vm324_vm2, %v323_v17 }
 0x259   : > { %587 = vmatpush1.msk.msra.mxu1 %vm328_vm1, %v162_v1  ;;  %472 = vmatprep.mubr.f32.mxu1 %v750_v12 }
 0x25c   : > { %588 = vmatmul.mubr.msk.f32.vlgmr.msra.gmra.mrb[2].mxu1 %vm324_vm2, %v323_v17 }
 0x32b   : > { %v403_v18 = vpop.f32.mrb[0].mxu1 }
 0x32c   : > { %v404_v19 = vadd.f32 %v403_v18, %v161_v0  ;;  %v405_v20 = vpop.f32.mrb[1].mxu1 }
 0x32d   : > { %v406_v21 = vadd.f32 %v405_v20, %v165_v2 }
 0x32f   : > { %v483_v22 = vcombine.low %v404_v19, %v406_v21  ;;  %v474_v23 = vpop.f32.mrb[2].mxu1 }
 0x330   : > { %v475_v24 = vadd.f32 %v474_v23, %v162_v1  ;;  %v476_v25 = vpop.f32.mrb[3].mxu1 }
 0x331   : > { %487 = vst [vmem:[%s160_s30] sm:$0xff] %v483_v22  ;;  %v477_v26 = vadd.f32 %v476_v25, %v166_v3 }
 0x333   : > { %v484_v27 = vcombine.low %v475_v24, %v477_v26 }
 0x335   : > { %488 = vst [vmem:[%s160_s30 + $0x8] sm:$0xff] %v484_v27 }
 0x336   : > { %694 = shalt.err (!%p691_p4)
}
 0x337   : > { %s695_s15 = scalar_lea.hbm %s891_s6, 256  ;;  %s699_s20 = scalar_lea.hbm %s937_s2, 512 }
 0x338   : > { %p696_p5 = scmp.ne.s32.totalorder %s891_s6, %s695_s15  ;;  %p700_p0 = scmp.lt.u32.totalorder %s891_s6, %s937_s2 }
 0x339   : > { %p701_p1 = scmp.lt.u32.totalorder %s699_s20, %s695_s15  ;;  %p703_p6 = scmp.lt.u32.totalorder %s695_s15, %s891_s6 }
 0x33a   : > { %p697_p8 = pnand %p696_p5, %p946_p11 }
 0x33b   : > { %p702_p3 = por %p701_p1, %p700_p0 }
 0x33c   : > { %p698_p9 = pneg %p697_p8 }
 0x33d   : > { %p704_p12 = por %p703_p6, %p702_p3 }
 0x33f   : > { %p705_p13 = pnand %p704_p12, %p698_p9 }
 0x341   : > { %708 = shalt.err (!%p705_p13)
}
 0x342   : > { %600 = dma.vmem_to_hbm [thread:$0]  (%p946_p11), %s893_s3, 256, %s891_s6, %s490_s7  }
 0x343 PF: > { %s516_s26 = sand.u32 1, %s735_s11   ;;  %p947_p7 = scmp.ne.s32.totalorder %s942_s23, 0 }
 0x344   : > { %p948_p10 = scmp.ge.s32.totalorder %s747_s14, 2  ;;  %s517_s27 = scalar_lea.sflag [#allocation5], %s516_s26 }
 0x346   : > { %p607_p2 = pnand %p948_p10, %p947_p7 }
 0x348   : > { %730 = dma.done.wait (!%p607_p2), %s517_s27, 256  }
 0x349   : > { %732 = vsyncadd (!%p607_p2), %s517_s27, 4294967040  ;;  %p16_p4 = scmp.ge.s32.totalorder %s795_s16, 4   ;;  %s949_s11 = smov %s739_s12 }
 0x34a   : > { %s950_s12 = smov %s743_s13  ;;  %s951_s13 = smov %s807_s19 }
 0x34b   : > { %s952_s14 = smov %s795_s16  ;;  %18 = sbr.rel (!%p16_p4) target bundleno = 7 (0x7), region = 73 }
 0x352   :  { %522 = vsyncpa [#allocation4], 1 }
 0x353   :  { %524 = vsyncpa [#allocation4 + $0x1], 1 }
 0x354   :  { %525 = vsyncpa [#allocation5], 1 }
 0x355   :  { %527 = vsyncpa [#allocation5 + $0x1], 1 }

</bundles_post_ra>
